<compile_context>
chip_gen: v5e
topology: v5e:2x2
jax: 0.10.0
libtpu: 0.0.40
codegen_flags: <defaults>
</compile_context>

<pallas_src>
import math

import jax
import jax.numpy as jnp
from jax.experimental import pallas as pl
from jax.experimental.pallas import tpu as pltpu


def _round_up(x, m):
    return ((x + m - 1) // m) * m


# 48 MiB: fits v7x's 64 MiB physical VMEM with headroom; plenty on v5e/v6e.
_VMEM_LIMIT = 48 * 1024 * 1024


# ---------------------------------------------------------------------------
# Kernel 1 (layer 0 only): support = X @ W + b, row- and K(fin)-tiled.
# ---------------------------------------------------------------------------
def _linear_kernel(x_ref, w_ref, b_ref, o_ref, acc_ref):
    k = pl.program_id(1)

    @pl.when(k == 0)
    def _():
        acc_ref[...] = jnp.zeros_like(acc_ref)

    acc_ref[...] += jnp.dot(x_ref[...], w_ref[...],
                            preferred_element_type=jnp.float32)

    @pl.when(k == pl.num_programs(1) - 1)
    def _():
        o_ref[...] = (acc_ref[...] + b_ref[...]).astype(o_ref.dtype)


def linear_pallas(x, w, b, *, row_tile, n_rows, out_dtype):
    """X @ W + b, tiled over rows and the input-feature (K) axis.

    Output shape (n_rows, round_up(Fout, 128)).  NOTE: padded *rows* of the
    output equal the broadcast bias (0 @ W + b), NOT zero; padded feature
    *columns* are exactly zero (W columns / b entries are zero-padded).  This
    is safe downstream because the adjacency's padded columns are zero, so the
    bias-filled rows never contribute to any aggregation.
    """
    n, fin = x.shape
    fout = w.shape[1]
    fout_p = _round_up(fout, 128)
    fin_tile = min(512, _round_up(fin, 128))
    fin_p = _round_up(fin, fin_tile)
    assert n_rows % row_tile == 0 and n_rows >= n

    x_p = jnp.pad(x, ((0, n_rows - n), (0, fin_p - fin)))
    w_p = jnp.pad(w, ((0, fin_p - fin), (0, fout_p - fout)))
    b_p = jnp.pad(b, (0, fout_p - fout)).astype(jnp.float32).reshape(1, fout_p)

    flops = 2 * n_rows * fin_p * fout_p
    bytes_accessed = (x_p.size * x_p.dtype.itemsize
                      + w_p.size * w_p.dtype.itemsize
                      + b_p.size * b_p.dtype.itemsize
                      + n_rows * fout_p * jnp.dtype(out_dtype).itemsize)

    return pl.pallas_call(
        _linear_kernel,
        out_shape=jax.ShapeDtypeStruct((n_rows, fout_p), out_dtype),
        grid_spec=pltpu.PrefetchScalarGridSpec(
            num_scalar_prefetch=0,
            grid=(n_rows // row_tile, fin_p // fin_tile),
            in_specs=[
                pl.BlockSpec((row_tile, fin_tile), lambda i, k: (i, k)),  # X
                pl.BlockSpec((fin_tile, fout_p), lambda i, k: (k, 0)),    # W
                pl.BlockSpec((1, fout_p), lambda i, k: (0, 0)),           # b
            ],
            out_specs=pl.BlockSpec((row_tile, fout_p), lambda i, k: (i, 0)),
            scratch_shapes=[pltpu.VMEM((row_tile, fout_p), jnp.float32)],
        ),
        compiler_params=pltpu.CompilerParams(
            dimension_semantics=("parallel", "arbitrary"),
            vmem_limit_bytes=_VMEM_LIMIT,
        ),
        cost_estimate=pl.CostEstimate(
            flops=flops, transcendentals=0, bytes_accessed=bytes_accessed),
    )(x_p, w_p, b_p)


# ---------------------------------------------------------------------------
# Kernel 2 (intermediate layers): support_next = relu(A @ support) @ W + b.
#   K-tiled f32 accumulator over the node axis; the next layer's Linear is
#   applied in the finalize branch while the (Fp_prev, Fp_next) W stays
#   resident in VMEM (constant-index BlockSpec).
# ---------------------------------------------------------------------------
def _aggregate_relu_linear_kernel(a_ref, s_ref, w_ref, b_ref, o_ref, acc_ref):
    k = pl.program_id(1)

    @pl.when(k == 0)
    def _():
        acc_ref[...] = jnp.zeros_like(acc_ref)

    acc_ref[...] += jnp.dot(a_ref[...], s_ref[...],
                            preferred_element_type=jnp.float32)

    @pl.when(k == pl.num_programs(1) - 1)
    def _():
        h = jnp.maximum(acc_ref[...], 0.0).astype(w_ref.dtype)
        o_ref[...] = (jnp.dot(h, w_ref[...], preferred_element_type=jnp.float32)
                      + b_ref[...]).astype(o_ref.dtype)


def aggregate_relu_linear_pallas(a_p, s_p, w_p, b_p, *, tm, tk, out_dtype):
    n_rows, n_cols = a_p.shape
    fin_p = s_p.shape[1]
    fout_p = w_p.shape[1]
    assert n_rows % tm == 0 and n_cols % tk == 0
    assert s_p.shape[0] == n_cols and w_p.shape[0] == fin_p

    flops = 2 * n_rows * n_cols * fin_p + 2 * n_rows * fin_p * fout_p
    bytes_accessed = (a_p.size * a_p.dtype.itemsize
                      + (n_rows // tm) * s_p.size * s_p.dtype.itemsize
                      + w_p.size * w_p.dtype.itemsize
                      + n_rows * fout_p * jnp.dtype(out_dtype).itemsize)

    return pl.pallas_call(
        _aggregate_relu_linear_kernel,
        out_shape=jax.ShapeDtypeStruct((n_rows, fout_p), out_dtype),
        grid_spec=pltpu.PrefetchScalarGridSpec(
            num_scalar_prefetch=0,
            grid=(n_rows // tm, n_cols // tk),
            in_specs=[
                pl.BlockSpec((tm, tk), lambda i, k: (i, k)),        # A block
                pl.BlockSpec((tk, fin_p), lambda i, k: (k, 0)),     # support
                pl.BlockSpec((fin_p, fout_p), lambda i, k: (0, 0)),  # W_next
                pl.BlockSpec((1, fout_p), lambda i, k: (0, 0)),      # b_next
            ],
            out_specs=pl.BlockSpec((tm, fout_p), lambda i, k: (i, 0)),
            scratch_shapes=[pltpu.VMEM((tm, fin_p), jnp.float32)],
        ),
        compiler_params=pltpu.CompilerParams(
            dimension_semantics=("parallel", "arbitrary"),
            vmem_limit_bytes=_VMEM_LIMIT,
        ),
        cost_estimate=pl.CostEstimate(
            flops=flops, transcendentals=0, bytes_accessed=bytes_accessed),
    )(a_p, s_p, w_p, b_p)


# ---------------------------------------------------------------------------
# Kernel 3 (last layer): h = relu(A @ support), K-tiled f32 accumulator.
# ---------------------------------------------------------------------------
def _aggregate_relu_kernel(a_ref, s_ref, o_ref, acc_ref):
    k = pl.program_id(1)

    @pl.when(k == 0)
    def _():
        acc_ref[...] = jnp.zeros_like(acc_ref)

    acc_ref[...] += jnp.dot(a_ref[...], s_ref[...],
                            preferred_element_type=jnp.float32)

    @pl.when(k == pl.num_programs(1) - 1)
    def _():
        o_ref[...] = jnp.maximum(acc_ref[...], 0.0).astype(o_ref.dtype)


def aggregate_relu_pallas(a_p, s_p, *, tm, tk, out_dtype):
    n_rows, n_cols = a_p.shape
    fout_p = s_p.shape[1]
    assert n_rows % tm == 0 and n_cols % tk == 0 and s_p.shape[0] == n_cols

    flops = 2 * n_rows * n_cols * fout_p
    bytes_accessed = (a_p.size * a_p.dtype.itemsize
                      + (n_rows // tm) * s_p.size * s_p.dtype.itemsize
                      + n_rows * fout_p * jnp.dtype(out_dtype).itemsize)

    return pl.pallas_call(
        _aggregate_relu_kernel,
        out_shape=jax.ShapeDtypeStruct((n_rows, fout_p), out_dtype),
        grid_spec=pltpu.PrefetchScalarGridSpec(
            num_scalar_prefetch=0,
            grid=(n_rows // tm, n_cols // tk),
            in_specs=[
                pl.BlockSpec((tm, tk), lambda i, k: (i, k)),      # A block
                pl.BlockSpec((tk, fout_p), lambda i, k: (k, 0)),  # support
            ],
            out_specs=pl.BlockSpec((tm, fout_p), lambda i, k: (i, 0)),
            scratch_shapes=[pltpu.VMEM((tm, fout_p), jnp.float32)],
        ),
        compiler_params=pltpu.CompilerParams(
            dimension_semantics=("parallel", "arbitrary"),
            vmem_limit_bytes=_VMEM_LIMIT,
        ),
        cost_estimate=pl.CostEstimate(
            flops=flops, transcendentals=0, bytes_accessed=bytes_accessed),
    )(a_p, s_p)


# ---------------------------------------------------------------------------
# Glue: parameters, normalization, forward loop, reference.
# ---------------------------------------------------------------------------
def make_grace_encoder_params(key, in_feats, out_feats, num_layers):
    shapes = [in_feats] + [2 * out_feats] * (num_layers - 1) + [out_feats]
    params = []
    for i in range(num_layers):
        fin, fout = shapes[i], shapes[i + 1]
        key, kw, kb = jax.random.split(key, 3)
        bound = 1.0 / jnp.sqrt(fin)
        w = jax.random.uniform(kw, (fin, fout), jnp.float32, -bound, bound)
        b = jax.random.uniform(kb, (fout,), jnp.float32, -bound, bound)
        params.append((w, b))
    return params


def sym_normalize(adj):
    """A_hat = D^{-1/2} (A + I) D^{-1/2}  (standard GCN normalization)."""
    n = adj.shape[0]
    a = adj + jnp.eye(n, dtype=adj.dtype)
    deg = jnp.sum(a, axis=1)
    d_inv_sqrt = jnp.where(deg > 0, 1.0 / jnp.sqrt(deg), 0.0)
    return a * d_inv_sqrt[:, None] * d_inv_sqrt[None, :]


def grace_encoder_forward(a_hat, x, params, *, tm=1024, tk=1024,
                          matmul_dtype=jnp.bfloat16):
    """Pallas forward for GraceEncoder: relu(A_hat @ (h @ W + b)) per layer.

    Layer 0 uses the standalone linear kernel; every subsequent layer's Linear
    is fused into the previous aggregation's finalize, so intermediates never
    round-trip through HBM in f32 and are never sliced/re-padded.
    """
    n = a_hat.shape[0]
    num_layers = len(params)

    # Lane-aligned tiles, clamped to the problem size; keep >=2 row blocks when
    # N allows so both v7x TensorCores get work on the "parallel" row axis.
    tm_eff = max(128, min(_round_up(tm, 128), _round_up(n, 128)))
    tk_eff = max(128, min(_round_up(tk, 128), _round_up(n, 128)))
    while tm_eff > 128 and _round_up(n, 128) // tm_eff < 2:
        tm_eff = max(128, _round_up(tm_eff // 2, 128))

    n_p = _round_up(n, math.lcm(tm_eff, tk_eff))

    # Pad + cast the (N, N) normalized adjacency ONCE: it is the dominant N^2
    # HBM read and reused by every layer; accumulation stays f32 in-kernel.
    a_p = jnp.pad(a_hat, ((0, n_p - n), (0, n_p - n))).astype(matmul_dtype)

    # Layer 0: support_0 = X @ W0 + b0 (bf16 operands, f32 accumulation).
    w0, b0 = params[0]
    support = linear_pallas(x.astype(matmul_dtype), w0.astype(matmul_dtype), b0,
                            row_tile=tm_eff, n_rows=n_p, out_dtype=matmul_dtype)

    # Layers 1..L-1: support_i = relu(A @ support_{i-1}) @ W_i + b_i (fused).
    for i in range(1, num_layers):
        w, b = params[i]
        fin_prev_p = support.shape[1]
        fout = w.shape[1]
        fout_p = _round_up(fout, 128)
        # Zero-pad W's input rows up to the previous padded width so the
        # (zero) padded feature columns of h cannot contaminate the result.
        w_p = jnp.pad(w, ((0, fin_prev_p - w.shape[0]),
                          (0, fout_p - fout))).astype(matmul_dtype)
        b_p = jnp.pad(b, (0, fout_p - fout)).astype(jnp.float32).reshape(1, fout_p)
        support = aggregate_relu_linear_pallas(
            a_p, support, w_p, b_p, tm=tm_eff, tk=tk_eff, out_dtype=matmul_dtype)

    # Final aggregation + relu of the last layer, emitted in f32.
    h_pad = aggregate_relu_pallas(a_p, support, tm=tm_eff, tk=tk_eff,
                                  out_dtype=jnp.float32)

    fout_last = params[-1][0].shape[1]
    return h_pad[:n, :fout_last]


def grace_encoder_reference(a_hat, x, params):
    h = x
    hp = jax.lax.Precision.HIGHEST
    for (w, b) in params:
        h = jnp.maximum(
            jnp.dot(a_hat, jnp.dot(h, w, precision=hp) + b, precision=hp), 0.0)
    return h


if __name__ == "__main__":
    key = jax.random.PRNGKey(0)
    k_adj, k_x, k_params = jax.random.split(key, 3)

    # Small, deliberately non-128-multiple node count to exercise padding.
    num_nodes = 200
    in_feats = 32
    out_feats = 16
    num_layers = 2

    # Deterministic synthetic graph (symmetric binary adjacency) + features.
    rand = jax.random.uniform(k_adj, (num_nodes, num_nodes))
    adj = (rand + rand.T > 1.7).astype(jnp.float32)
    adj = adj * (1.0 - jnp.eye(num_nodes, dtype=jnp.float32))  # no self loops yet
    a_hat = sym_normalize(adj)

    x = jax.random.normal(k_x, (num_nodes, in_feats), jnp.float32)
    params = make_grace_encoder_params(k_params, in_feats, out_feats, num_layers)

    ref = grace_encoder_reference(a_hat, x, params)

    # f32 matmul path: matches the reference math tightly.
    out_f32 = jax.block_until_ready(
        grace_encoder_forward(a_hat, x, params, matmul_dtype=jnp.float32))
    assert out_f32.shape == (num_nodes, out_feats)
    assert jnp.allclose(out_f32, ref, atol=1e-3, rtol=1e-3)

    # bf16 matmul path (default): bf16 operands everywhere, f32 accumulation.
    out_bf16 = jax.block_until_ready(grace_encoder_forward(a_hat, x, params))
    assert out_bf16.shape == (num_nodes, out_feats)
    assert jnp.allclose(out_bf16, ref, atol=3e-2, rtol=3e-2)

    # 3-layer model exercises more than one fused aggregate+linear layer.
    params3 = make_grace_encoder_params(k_params, in_feats, out_feats, 3)
    ref3 = grace_encoder_reference(a_hat, x, params3)
    out3 = jax.block_until_ready(
        grace_encoder_forward(a_hat, x, params3, matmul_dtype=jnp.float32))
    assert out3.shape == (num_nodes, out_feats)
    assert jnp.allclose(out3, ref3, atol=1e-3, rtol=1e-3)

    print("KERNEL_OK")
</pallas_src>

<mosaic_0001>
module attributes {stable_mosaic.version = 11 : i64} {
  func.func @_linear_kernel(%arg0: i32, %arg1: i32, %arg2: memref<128x128xf32, #tpu.memory_space<vmem>>, %arg3: memref<128x128xf32, #tpu.memory_space<vmem>>, %arg4: memref<1x128xf32, #tpu.memory_space<vmem>>, %arg5: memref<128x128xf32, #tpu.memory_space<vmem>>, %arg6: memref<128x128xf32, #tpu.memory_space<vmem>>) attributes {dimension_semantics = [#tpu.dimension_semantics<parallel>, #tpu.dimension_semantics<arbitrary>], iteration_bounds = array<i64: 2, 1>, scalar_prefetch = 0 : i64, scratch_operands = 1 : i64, tpu.core_type = #tpu.core_type<tc>, window_params = [{transform_indices = @transform_0, window_bounds = array<i64: 128, 128>}, {transform_indices = @transform_1, window_bounds = array<i64: 128, 128>}, {pipeline_mode = #tpu.pipeline_mode<synchronous>, transform_indices = @transform_2, window_bounds = array<i64: 1, 128>}, {transform_indices = @transform_3, window_bounds = array<i64: 128, 128>}]} {
    %c0_i32 = arith.constant 0 : i32
    %0 = arith.cmpi eq, %arg1, %c0_i32 : i32
    %1 = arith.extui %0 : i1 to i32
    %c0_i32_0 = arith.constant 0 : i32
    %2 = arith.cmpi ne, %1, %c0_i32_0 : i32
    scf.if %2 {
      %cst_10 = arith.constant 0.000000e+00 : f32
      %12 = vector.broadcast %cst_10 : f32 to vector<128x128xf32>
      %c0_11 = arith.constant 0 : index
      %c0_12 = arith.constant 0 : index
      %13 = vector.load %arg6[%c0_11, %c0_12] : memref<128x128xf32, #tpu.memory_space<vmem>>, vector<128x128xf32>
      tpu.vector_store %arg6[%c0_11, %c0_12], %12 {strides = array<i32>} : memref<128x128xf32, #tpu.memory_space<vmem>>, vector<128x128xf32>,
    } else {
    }
    %c0 = arith.constant 0 : index
    %c0_1 = arith.constant 0 : index
    %3 = vector.load %arg6[%c0, %c0_1] : memref<128x128xf32, #tpu.memory_space<vmem>>, vector<128x128xf32>
    %c0_2 = arith.constant 0 : index
    %c0_3 = arith.constant 0 : index
    %4 = vector.load %arg2[%c0_2, %c0_3] : memref<128x128xf32, #tpu.memory_space<vmem>>, vector<128x128xf32>
    %c0_4 = arith.constant 0 : index
    %c0_5 = arith.constant 0 : index
    %5 = vector.load %arg3[%c0_4, %c0_5] : memref<128x128xf32, #tpu.memory_space<vmem>>, vector<128x128xf32>
    %cst = arith.constant dense<0.000000e+00> : vector<128x128xf32>
    %6 = tpu.matmul %4, %5, %cst {dimension_numbers = #tpu.dot_dimension_numbers<[1], [0], [0], [1], [0, 0, 1, 1], [], []>} : vector<128x128xf32>, vector<128x128xf32>, vector<128x128xf32> -> vector<128x128xf32>
    %7 = arith.addf %3, %6 : vector<128x128xf32>
    %c0_6 = arith.constant 0 : index
    %c0_7 = arith.constant 0 : index
    %8 = vector.load %arg6[%c0_6, %c0_7] : memref<128x128xf32, #tpu.memory_space<vmem>>, vector<128x128xf32>
    tpu.vector_store %arg6[%c0_6, %c0_7], %7 {strides = array<i32>} : memref<128x128xf32, #tpu.memory_space<vmem>>, vector<128x128xf32>,
    %c0_i32_8 = arith.constant 0 : i32
    %9 = arith.cmpi eq, %arg1, %c0_i32_8 : i32
    %10 = arith.extui %9 : i1 to i32
    %c0_i32_9 = arith.constant 0 : i32
    %11 = arith.cmpi ne, %10, %c0_i32_9 : i32
    scf.if %11 {
      %c0_10 = arith.constant 0 : index
      %c0_11 = arith.constant 0 : index
      %12 = vector.load %arg6[%c0_10, %c0_11] : memref<128x128xf32, #tpu.memory_space<vmem>>, vector<128x128xf32>
      %c0_12 = arith.constant 0 : index
      %c0_13 = arith.constant 0 : index
      %13 = vector.load %arg4[%c0_12, %c0_13] : memref<1x128xf32, #tpu.memory_space<vmem>>, vector<1x128xf32>
      %14 = vector.broadcast %13 : vector<1x128xf32> to vector<128x128xf32>
      %15 = arith.addf %12, %14 : vector<128x128xf32>
      %c0_14 = arith.constant 0 : index
      %c0_15 = arith.constant 0 : index
      %16 = vector.load %arg5[%c0_14, %c0_15] : memref<128x128xf32, #tpu.memory_space<vmem>>, vector<128x128xf32>
      tpu.vector_store %arg5[%c0_14, %c0_15], %15 {strides = array<i32>} : memref<128x128xf32, #tpu.memory_space<vmem>>, vector<128x128xf32>,
    } else {
    }
    return
  }
  func.func @transform_0(%arg0: i32, %arg1: i32) -> (i32, i32) {
    %c0_i32 = arith.constant 0 : i32
    return %arg0, %arg1 : i32, i32
  }
  func.func @transform_1(%arg0: i32, %arg1: i32) -> (i32, i32) {
    %c0_i32 = arith.constant 0 : i32
    %c0_i32_0 = arith.constant 0 : i32
    return %arg1, %c0_i32 : i32, i32
  }
  func.func @transform_2(%arg0: i32, %arg1: i32) -> (i32, i32) {
    %c0_i32 = arith.constant 0 : i32
    %c0_i32_0 = arith.constant 0 : i32
    %c0_i32_1 = arith.constant 0 : i32
    return %c0_i32, %c0_i32_0 : i32, i32
  }
  func.func @transform_3(%arg0: i32, %arg1: i32) -> (i32, i32) {
    %c0_i32 = arith.constant 0 : i32
    %c0_i32_0 = arith.constant 0 : i32
    return %arg0, %c0_i32 : i32, i32
  }
}

</mosaic_0001>

<bundles_post_ra>
// kernel: tpu_custom_call.1
= control target key start
LH: loop header
LB: loop body
LE: loop exit
PB: predicated region body
PF: predicated region fallthrough
CT: control target
= control target key end

     0   :  { %s1082_s0 = inlined_call_operand.hbm [shape: f32[256,128], index: 0, kind: input, shape index: {}]   ;;  %s1083_s1 = inlined_call_operand.hbm [shape: f32[128,128], index: 1, kind: input, shape index: {}]   ;;  %s1084_s2 = inlined_call_operand.vmem [shape: f32[1,128], index: 2, kind: input, shape index: {}]   ;;  %s1085_s3 = inlined_call_operand.hbm [shape: f32[256,128], index: 3, kind: output, shape index: {}]  }
   0x1   :  { %1087 = sst [smem:[#allocation12_spill]] %s1083_s1 }
   0x2   :  { %8 = vsyncpa [#allocation4], 0 }
   0x3   :  { %10 = vsyncpa [#allocation4 + $0x1], 0 }
   0x4   :  { %11 = vsyncpa [#allocation7], 0 }
   0x5   :  { %12 = vsyncpa [#allocation5], 0 }
   0x6   :  { %14 = vsyncpa [#allocation5 + $0x1], 0  ;;  %s883_s12 = smov 0   ;;  %s885_s13 = smov 0  }
   0x7   :  { %s887_s14 = smov 0   ;;  %s889_s15 = smov 0  }
   0x8   :  { %s891_s16 = smov 0   ;;  %s893_s17 = smov 0  }
   0x9 LB: > { %s565_s18 = sadd.s32 4294967295, %s856_s17   ;;  %s566_s19 = sadd.s32 4294967294, %s856_s17   ;;  %s856_s17 = sphi %s893_s17, %s20_s17   ;;  %s852_s16 = sphi %s891_s16, %s1101_s16   ;;  %s848_s15 = sphi %s889_s15, %s1100_s15   ;;  %s844_s14 = sphi %s887_s14, %s1099_s14   ;;  %s840_s13 = sphi %s885_s13, %s1098_s13   ;;  %s836_s12 = sphi %s883_s12, %s1097_s12  }
   0xa   : > { %p54_p0 = scmp.ne.s32.totalorder %s840_s13, %s836_s12  ;;  %p917_p1 = scmp.eq.s32.totalorder %s565_s18, 0 }
   0xb   : > { %p921_p2 = scmp.eq.s32.totalorder %s565_s18, 1  ;;  %p131_p3 = scmp.eq.s32.totalorder %s566_s19, 1 }
   0xc   : > { %p927_p4 = por %p917_p1, %p54_p0  ;;  %p567_p5 = scmp.ge.s32.totalorder %s856_s17, 1 }
   0xd   : > { %p932_p6 = por %p131_p3, %p54_p0  ;;  %p138_p7 = scmp.lt.s32.totalorder %s856_s17, 3 }
   0xe   : > { %s1092_s1 = sld [smem:[#allocation12_spill]]  ;;  %s858_s28 = smov [#allocation6]  }
   0xf   : > { %p940_p8 = pnand %p567_p5, %p138_p7  ;;  %s154_s29 = sshll.u32 %s858_s28, 4  ;;  %s155_s29 = int_to_ptr.vmem [resolvable:$true] %s154_s29 }
  0x10   : > { %p569_p11 = scmp.ge.s32.totalorder %s856_s17, 2  ;;  %s1086_s30 = smov 128  }
  0x11   : > { %p640_p9 = pneg %p940_p8  ;;  %s860_s4 = smov 8  }
  0x12   : > { %s32_s5 = sadd.s32 1, %s852_s16  ;;  %s41_s6 = sadd.s32 1, %s844_s14 }
  0x13   : > { %p641_p10 = pnand %p640_p9, %p917_p1  ;;  %p34_p12 = scmp.ge.s32.totalorder %s32_s5, 2 }
  0x14   : > { %s152_s26 = sshll.u32 %s1092_s1, 4  ;;  %p48_p13 = scmp.ne.s32.totalorder %s844_s14, %s840_s13  ;;  %s153_s26 = int_to_ptr.hbm [resolvable:$true] %s152_s26 }
  0x15   : > { %643 = dma.hbm_to_vmem [thread:$0]  (!%p641_p10), %s153_s26, 2048, %s155_s29, [#allocation7], %s1086_s30, %s1086_s30, %s860_s4  }
  0x16   : > { %p49_p0 = scmp.eq.s32.totalorder %s856_s17, 0  ;;  %s1103_s5 = smov (%p34_p12, %s32_s5), 0 }
  0x17   : > { %p965_p5 = por %p921_p2, %p48_p13  ;;  %s36_s9 = ssub.s32 %s852_s16, %s1103_s5 }
  0x18   : > { %p959_p3 = por %p49_p0, %p48_p13  ;;  %p653_p7 = scmp.lt.s32.totalorder %s856_s17, 2 }
  0x19   : > { %p39_p9 = scmp.eq.s32.totalorder %s36_s9, 0  ;;  %s171_s10 = sand.u32 1, %s844_s14  }
  0x1a   : > { %s570_s11 = sshll.u32 %s171_s10, 7  ;;  %s582_s19 = sshll.u32 %s852_s16, 7 }
  0x1b   : > { %s974_s18 = scalar_select %p39_p9, %s844_s14, %s41_s6  }
  0x1c   : > { %s181_s26 = scalar_lea.hbm %s1082_s0, %s582_s19  ;;  %s175_s28 = scalar_lea.vmem [#allocation3], %s570_s11 }
  0x1d   : > { %s184_s29 = sshll.u32 %s175_s28, 4  ;;  %s182_s21 = sshll.u32 %s181_s26, 4  ;;  %s185_s29 = int_to_ptr.vmem [resolvable:$true] %s184_s29  ;;  %s183_s21 = int_to_ptr.hbm [resolvable:$true] %s182_s21 }
  0x1e   : > { %p645_p2 = pnand %p653_p7, %p959_p3  ;;  %s172_s30 = scalar_lea.sflag [#allocation4], %s171_s10 }
  0x1f   : > { %s1096_s1 = smov 128   ;;  %196 = sbr.rel (%p940_p8) target bundleno = 234 (0xea), region = 32 }
  0x20   : > { %647 = dma.hbm_to_vmem [thread:$0]  (!%p645_p2), %s183_s21, 2048, %s185_s29, %s172_s30, %s1096_s1, %s1096_s1, %s860_s4  }
  0x21   : > { %s988_s6 = sand.u32 (!%p940_p8), 1, %s840_s13  }
  0x22   : > { %s574_s9 = sshll.u32 (!%p940_p8), %s988_s6, 7  ;;  %s199_s11 = scalar_lea.sflag (!%p940_p8), [#allocation4], %s988_s6 }
  0x23   : > { %s994_s7 = scalar_lea.vmem (!%p940_p8), [#allocation3], %s574_s9 }
  0x24   : > { %823 = dma.done.wait (%p927_p4), %s199_s11, 2048  }
  0x25   : > { %825 = vsyncadd (%p927_p4), %s199_s11, 4294965248 }
  0x26   : > { %827 = dma.done.wait (%p917_p1), [#allocation7], 2048  }
  0x27   : > { %829 = vsyncadd (%p917_p1), [#allocation7], 4294965248  ;;  %v301_v0 = vld [vmem:[#allocation6 + $0x78] sm:$0xff]  ;;  %v300_v1 = vld [vmem:[#allocation6 + $0x70] sm:$0xff]  ;;  %s1025_s22 = scalar_lea.vmem [#allocation8], %s574_s9  ;;  %s583_s27 = sshll.u32 %s848_s15, 7 }
  0x28   : > { %585 = vmatpush.msra.mxu2 %v301_v0  ;;  %586 = vmatpush.msra.mxu3 %v301_v0  ;;  %v299_v2 = vld [vmem:[#allocation6 + $0x68] sm:$0xff]  ;;  %v298_v3 = vld [vmem:[#allocation6 + $0x60] sm:$0xff]  ;;  %v297_v4 = vld [vmem:[#allocation6 + $0x58] sm:$0xff]  ;;  %s466_s10 = scalar_lea.hbm %s1085_s3, %s583_s27  ;;  %s467_s19 = sshll.u32 %s1025_s22, 4  ;;  %s468_s19 = int_to_ptr.vmem [resolvable:$true] %s467_s19 }
  0x29   : > { %302 = vmatpush.msra.mxu0 %v301_v0  ;;  %584 = vmatpush.msra.mxu1 %v301_v0  ;;  %v296_v5 = vld [vmem:[#allocation6 + $0x50] sm:$0xff]  ;;  %v295_v6 = vld [vmem:[#allocation6 + $0x48] sm:$0xff]  ;;  %v294_v7 = vld [vmem:[#allocation6 + $0x40] sm:$0xff]  ;;  %s469_s24 = sshll.u32 %s466_s10, 4  ;;  %s455_s15 = scalar_lea.sflag [#allocation5], %s988_s6  ;;  %s470_s24 = int_to_ptr.hbm [resolvable:$true] %s469_s24 }
  0x2a   : > { %588 = vmatpush.msra.mxu2 %v300_v1  ;;  %589 = vmatpush.msra.mxu3 %v300_v1  ;;  %v293_v8 = vld [vmem:[#allocation6 + $0x38] sm:$0xff]  ;;  %v292_v9 = vld [vmem:[#allocation6 + $0x30] sm:$0xff]  ;;  %v291_v10 = vld [vmem:[#allocation6 + $0x28] sm:$0xff]  ;;  %s784_s25 = sshra.s32 %s470_s24, 4  ;;  %s790_s21 = scalar_lea.hbm %s1085_s3, 256  ;;  %s785_s25 = int_to_ptr.hbm [resolvable:$true] %s784_s25 }
  0x2b   : > { %303 = vmatpush.msra.mxu0 %v300_v1  ;;  %587 = vmatpush.msra.mxu1 %v300_v1  ;;  %v290_v11 = vld [vmem:[#allocation6 + $0x20] sm:$0xff]  ;;  %v289_v12 = vld [vmem:[#allocation6 + $0x18] sm:$0xff]  ;;  %v288_v13 = vld [vmem:[#allocation6 + $0x10] sm:$0xff]  ;;  %s786_s26 = scalar_lea.hbm %s785_s25, 128  ;;  %p791_p10 = scmp.lt.s32.totalorder %s785_s25, %s1085_s3 }
  0x2c   : > { %591 = vmatpush.msra.mxu2 %v299_v2  ;;  %592 = vmatpush.msra.mxu3 %v299_v2  ;;  %v287_v14 = vld [vmem:[#allocation6 + $0x8] sm:$0xff]  ;;  %v286_v15 = vld [vmem:[#allocation6] sm:$0xff]  ;;  %v280_v24 = vld [vmem:[%s994_s7 + $0x50] sm:$0xff]  ;;  %p787_p1 = scmp.ne.s32.totalorder %s785_s25, %s786_s26  ;;  %p792_p12 = scmp.lt.s32.totalorder %s790_s21, %s786_s26 }
  0x2d   : > { %304 = vmatpush.msra.mxu0 %v299_v2  ;;  %590 = vmatpush.msra.mxu1 %v299_v2  ;;  %v278_v16 = vld [vmem:[%s994_s7 + $0x40] sm:$0xff]  ;;  %v279_v20 = vld [vmem:[%s994_s7 + $0x48] sm:$0xff]  ;;  %v284_v25 = vld [vmem:[%s994_s7 + $0x70] sm:$0xff] }
  0x2e   : > { %594 = vmatpush.msra.mxu2 %v298_v3  ;;  %595 = vmatpush.msra.mxu3 %v298_v3  ;;  %v282_v17 = vld [vmem:[%s994_s7 + $0x60] sm:$0xff]  ;;  %v283_v21 = vld [vmem:[%s994_s7 + $0x68] sm:$0xff]  ;;  %v272_v26 = vld [vmem:[%s994_s7 + $0x10] sm:$0xff]  ;;  %p788_p4 = pnand %p787_p1, %p965_p5  ;;  %p793_p13 = por %p792_p12, %p791_p10 }
  0x2f   : > { %305 = vmatpush.msra.mxu0 %v298_v3  ;;  %593 = vmatpush.msra.mxu1 %v298_v3  ;;  %v270_v18 = vld [vmem:[%s994_s7] sm:$0xff]  ;;  %v271_v22 = vld [vmem:[%s994_s7 + $0x8] sm:$0xff]  ;;  %v276_v27 = vld [vmem:[%s994_s7 + $0x30] sm:$0xff] }
  0x30   : > { %597 = vmatpush.msra.mxu2 %v297_v4  ;;  %598 = vmatpush.msra.mxu3 %v297_v4  ;;  %v274_v19 = vld [vmem:[%s994_s7 + $0x20] sm:$0xff]  ;;  %v275_v23 = vld [vmem:[%s994_s7 + $0x28] sm:$0xff]  ;;  %v281_v28 = vld [vmem:[%s994_s7 + $0x58] sm:$0xff]  ;;  %p789_p8 = pneg %p788_p4 }
  0x31   : > { %306 = vmatpush.msra.mxu0 %v297_v4  ;;  %596 = vmatpush.msra.mxu1 %v297_v4  ;;  %v285_v29 = vld [vmem:[%s994_s7 + $0x78] sm:$0xff]  ;;  %v709_v32 = vld [vmem:[%s1084_s2] ss:$0 sm:$0xff] }
  0x32   : > { %600 = vmatpush.msra.mxu2 %v296_v5  ;;  %601 = vmatpush.msra.mxu3 %v296_v5  ;;  %v273_v30 = vld [vmem:[%s994_s7 + $0x18] sm:$0xff]  ;;  %p794_p0 = pnand %p793_p13, %p789_p8 }
  0x33   : > { %307 = vmatpush.msra.mxu0 %v296_v5  ;;  %599 = vmatpush.msra.mxu1 %v296_v5  ;;  %v277_v31 = vld [vmem:[%s994_s7 + $0x38] sm:$0xff] }
  0x34   : > { %603 = vmatpush.msra.mxu2 %v295_v6  ;;  %604 = vmatpush.msra.mxu3 %v295_v6 }
  0x35   : > { %308 = vmatpush.msra.mxu0 %v295_v6  ;;  %602 = vmatpush.msra.mxu1 %v295_v6 }
  0x36   : > { %606 = vmatpush.msra.mxu2 %v294_v7  ;;  %607 = vmatpush.msra.mxu3 %v294_v7 }
  0x37   : > { %309 = vmatpush.msra.mxu0 %v294_v7  ;;  %605 = vmatpush.msra.mxu1 %v294_v7 }
  0x38   : > { %609 = vmatpush.msra.mxu2 %v293_v8  ;;  %610 = vmatpush.msra.mxu3 %v293_v8 }
  0x39   : > { %310 = vmatpush.msra.mxu0 %v293_v8  ;;  %608 = vmatpush.msra.mxu1 %v293_v8 }
  0x3a   : > { %612 = vmatpush.msra.mxu2 %v292_v9  ;;  %613 = vmatpush.msra.mxu3 %v292_v9 }
  0x3b   : > { %311 = vmatpush.msra.mxu0 %v292_v9  ;;  %611 = vmatpush.msra.mxu1 %v292_v9 }
  0x3c   : > { %615 = vmatpush.msra.mxu2 %v291_v10  ;;  %616 = vmatpush.msra.mxu3 %v291_v10 }
  0x3d   : > { %312 = vmatpush.msra.mxu0 %v291_v10  ;;  %614 = vmatpush.msra.mxu1 %v291_v10 }
  0x3e   : > { %618 = vmatpush.msra.mxu2 %v290_v11  ;;  %619 = vmatpush.msra.mxu3 %v290_v11 }
  0x3f   : > { %313 = vmatpush.msra.mxu0 %v290_v11  ;;  %617 = vmatpush.msra.mxu1 %v290_v11 }
  0x40   : > { %621 = vmatpush.msra.mxu2 %v289_v12  ;;  %622 = vmatpush.msra.mxu3 %v289_v12 }
  0x41   : > { %314 = vmatpush.msra.mxu0 %v289_v12  ;;  %620 = vmatpush.msra.mxu1 %v289_v12 }
  0x42   : > { %624 = vmatpush.msra.mxu2 %v288_v13  ;;  %625 = vmatpush.msra.mxu3 %v288_v13 }
  0x43   : > { %315 = vmatpush.msra.mxu0 %v288_v13  ;;  %623 = vmatpush.msra.mxu1 %v288_v13 }
  0x44   : > { %627 = vmatpush.msra.mxu2 %v287_v14  ;;  %628 = vmatpush.msra.mxu3 %v287_v14 }
  0x45   : > { %316 = vmatpush.msra.mxu0 %v287_v14  ;;  %626 = vmatpush.msra.mxu1 %v287_v14 }
  0x46   : > { %630 = vmatpush.msra.mxu2 %v286_v15  ;;  %631 = vmatpush.msra.mxu3 %v286_v15 }
  0x47   : > { %342 = vmatmul.f32.vlgmr.msra.gmra.mxu2 %v278_v16  ;;  %354 = vmatmul.f32.vlgmr.msra.gmra.mxu3 %v282_v17 }
  0x48   : > { %317 = vmatpush.msra.mxu0 %v286_v15  ;;  %629 = vmatpush.msra.mxu1 %v286_v15 }
  0x49   : > { %318 = vmatmul.f32.vlgmr.msra.gmra.mxu0 %v270_v18  ;;  %330 = vmatmul.f32.vlgmr.msra.gmra.mxu1 %v274_v19 }
  0x4f   : > { %345 = vmatmul.f32.gmra.mxu2 %v279_v20  ;;  %357 = vmatmul.f32.gmra.mxu3 %v283_v21 }
  0x51   : > { %321 = vmatmul.f32.gmra.mxu0 %v271_v22  ;;  %333 = vmatmul.f32.gmra.mxu1 %v275_v23 }
  0x57   : > { %348 = vmatmul.f32.gmra.mxu2 %v280_v24  ;;  %360 = vmatmul.f32.gmra.mxu3 %v284_v25 }
  0x59   : > { %324 = vmatmul.f32.gmra.mxu0 %v272_v26  ;;  %336 = vmatmul.f32.gmra.mxu1 %v276_v27 }
  0x5f   : > { %351 = vmatmul.f32.gmra.mxu2 %v281_v28  ;;  %363 = vmatmul.f32.gmra.mxu3 %v285_v29 }
  0x61   : > { %327 = vmatmul.f32.gmra.mxu0 %v273_v30  ;;  %339 = vmatmul.f32.gmra.mxu1 %v277_v31 }
  0xc6   : > { %v319_v33 = vpop.f32.mrf.mxu0  ;;  %v331_v34 = vpop.f32.mrf.mxu1 }
  0xc7   : > { %v422_v35 = vadd.f32 %v709_v32, %v319_v33  ;;  %v426_v36 = vadd.f32 %v709_v32, %v331_v34 }
  0xc9   : > { %438 = vst [vmem:[%s1025_s22] sm:$0xff] %v422_v35 }
  0xca   : > { %442 = vst [vmem:[%s1025_s22 + $0x20] sm:$0xff] %v426_v36  ;;  %v343_v37 = vpop.f32.mrf.mxu2  ;;  %v355_v38 = vpop.f32.mrf.mxu3 }
  0xcb   : > { %v430_v39 = vadd.f32 %v709_v32, %v343_v37  ;;  %v434_v40 = vadd.f32 %v709_v32, %v355_v38 }
  0xcd   : > { %446 = vst [vmem:[%s1025_s22 + $0x40] sm:$0xff] %v430_v39 }
  0xce   : > { %450 = vst [vmem:[%s1025_s22 + $0x60] sm:$0xff] %v434_v40  ;;  %v322_v41 = vpop.f32.mrf.mxu0  ;;  %v334_v42 = vpop.f32.mrf.mxu1 }
  0xcf   : > { %v423_v43 = vadd.f32 %v709_v32, %v322_v41  ;;  %v427_v44 = vadd.f32 %v709_v32, %v334_v42 }
  0xd1   : > { %439 = vst [vmem:[%s1025_s22 + $0x8] sm:$0xff] %v423_v43 }
  0xd2   : > { %443 = vst [vmem:[%s1025_s22 + $0x28] sm:$0xff] %v427_v44  ;;  %v346_v45 = vpop.f32.mrf.mxu2  ;;  %v358_v46 = vpop.f32.mrf.mxu3 }
  0xd3   : > { %v431_v47 = vadd.f32 %v709_v32, %v346_v45  ;;  %v435_v48 = vadd.f32 %v709_v32, %v358_v46 }
  0xd5   : > { %447 = vst [vmem:[%s1025_s22 + $0x48] sm:$0xff] %v431_v47 }
  0xd6   : > { %451 = vst [vmem:[%s1025_s22 + $0x68] sm:$0xff] %v435_v48  ;;  %v325_v49 = vpop.f32.mrf.mxu0  ;;  %v337_v50 = vpop.f32.mrf.mxu1 }
  0xd7   : > { %v424_v51 = vadd.f32 %v709_v32, %v325_v49  ;;  %v428_v52 = vadd.f32 %v709_v32, %v337_v50 }
  0xd9   : > { %440 = vst [vmem:[%s1025_s22 + $0x10] sm:$0xff] %v424_v51 }
  0xda   : > { %444 = vst [vmem:[%s1025_s22 + $0x30] sm:$0xff] %v428_v52  ;;  %v349_v53 = vpop.f32.mrf.mxu2  ;;  %v361_v54 = vpop.f32.mrf.mxu3 }
  0xdb   : > { %v432_v55 = vadd.f32 %v709_v32, %v349_v53  ;;  %v436_v56 = vadd.f32 %v709_v32, %v361_v54 }
  0xdd   : > { %448 = vst [vmem:[%s1025_s22 + $0x50] sm:$0xff] %v432_v55 }
  0xde   : > { %452 = vst [vmem:[%s1025_s22 + $0x70] sm:$0xff] %v436_v56  ;;  %v328_v57 = vpop.f32.mrf.mxu0  ;;  %v340_v58 = vpop.f32.mrf.mxu1 }
  0xdf   : > { %v425_v59 = vadd.f32 %v709_v32, %v328_v57  ;;  %v429_v60 = vadd.f32 %v709_v32, %v340_v58 }
  0xe1   : > { %441 = vst [vmem:[%s1025_s22 + $0x18] sm:$0xff] %v425_v59 }
  0xe2   : > { %445 = vst [vmem:[%s1025_s22 + $0x38] sm:$0xff] %v429_v60  ;;  %v352_v61 = vpop.f32.mrf.mxu2  ;;  %v364_v62 = vpop.f32.mrf.mxu3 }
  0xe3   : > { %v433_v63 = vadd.f32 %v709_v32, %v352_v61  ;;  %v437_v0 = vadd.f32 %v709_v32, %v364_v62 }
  0xe5   : > { %449 = vst [vmem:[%s1025_s22 + $0x58] sm:$0xff] %v433_v63 }
  0xe6   : > { %453 = vst [vmem:[%s1025_s22 + $0x78] sm:$0xff] %v437_v0 }
  0xe7   : > { %797 = shalt.err (!%p794_p0)
}
  0xe8   : > { %s861_s6 = smov 128   ;;  %s862_s7 = smov 8  }
  0xe9   : > { %638 = dma.vmem_to_hbm [thread:$0]  (%p965_p5), %s468_s19, 2048, %s470_s24, %s455_s15, %s861_s6, %s861_s6, %s862_s7  }
  0xea PF: > { %s484_s1 = sand.u32 1, %s836_s12   ;;  %p649_p3 = pnand %p569_p11, %p932_p6 }
  0xeb   : > { %s485_s20 = scalar_lea.sflag [#allocation5], %s484_s1 }
  0xec   : > { %p650_p7 = pneg %p649_p3 }
  0xee   : > { %831 = dma.done.wait (%p650_p7), %s485_s20, 2048  }
  0xef   : > { %833 = vsyncadd (%p650_p7), %s485_s20, 4294965248  ;;  %s20_s17 = sadd.s32 1, %s856_s17   ;;  %s1097_s12 = smov %s840_s13 }
  0xf0   : > { %p17_p9 = scmp.ge.s32.totalorder %s20_s17, 4   ;;  %s1098_s13 = smov %s844_s14 }
  0xf1   : > { %s1099_s14 = smov %s974_s18  ;;  %s1100_s15 = smov %s852_s16 }
  0xf2   : > { %s1101_s16 = smov %s1103_s5  ;;  %19 = sbr.rel (!%p17_p9) target bundleno = 9 (0x9), region = 90 }
  0xf7   :  { %491 = vsyncpa [#allocation4], 1 }
  0xf8   :  { %493 = vsyncpa [#allocation4 + $0x1], 1 }
  0xf9   :  { %494 = vsyncpa [#allocation7], 1 }
  0xfa   :  { %495 = vsyncpa [#allocation5], 1 }
  0xfb   :  { %497 = vsyncpa [#allocation5 + $0x1], 1 }

</bundles_post_ra>
